<compile_context>
chip_gen: v7x
topology: tpu7x:2x2x1
jax: 0.10.0
libtpu: 0.0.40
codegen_flags: <defaults>
</compile_context>

<pallas_src>
import functools
import math

import jax
import jax.numpy as jnp
from jax import lax
from jax.experimental import pallas as pl
from jax.experimental.pallas import tpu as pltpu

EPS = 1e-6
_LANE = 128
_SUBLANE = 8
_TARGET_BLOCK_BYTES = 2 * 1024 * 1024  # ~2 MiB per input block


def _cdiv(a, b):
    return -(-a // b)


def _device_kind():
    try:
        return jax.devices()[0].device_kind.lower()
    except Exception:
        return ""


def _num_tensorcores():
    # TODO(synk): verify the leading "parallel" grid axis really shards across
    # the two TensorCores on v7x; if not, switch to pltpu.CORE_PARALLEL or an
    # explicit pl.core_map split.
    return 2 if "v7" in _device_kind() else 1


def _native_bf16_ok():
    # v6e/v7x VPUs handle bf16 natively; v5e and older do not.
    kind = _device_kind()
    return ("v6" in kind) or ("v7" in kind)


def _regdice_kernel(x_ref, y_ref, tp_ref, fpfn_ref, tp_acc, fpfn_acc, *,
                    s, tile, spp, need_mask, compute_dtype):
    p = pl.program_id(0)          # parallel block (spatial range / core)
    k = pl.program_id(1)          # reduction step within the block

    @pl.when(k == 0)
    def _init():
        tp_acc[...] = jnp.zeros_like(tp_acc)
        fpfn_acc[...] = jnp.zeros_like(fpfn_acc)

    def _accumulate(xv, yv):
        xv = xv.astype(compute_dtype)
        yv = yv.astype(compute_dtype)
        absdiff = jnp.abs(xv - yv)                 # relu(d) + relu(-d) = fp + fn
        tp_elem = jnp.maximum(yv - absdiff, 0)
        # Lane-wide f32 accumulators: pure vreg-wise adds, no cross-lane moves.
        tp_acc[...] += tp_elem.astype(jnp.float32)
        fpfn_acc[...] += absdiff.astype(jnp.float32)

    if not need_mask:
        _accumulate(x_ref[...], y_ref[...])
    else:
        t = p * spp + k                  # global tile index (may be a clamped dup)
        is_tail = (t + 1) * tile > s     # only ragged / clamped tiles need a mask

        @pl.when(jnp.logical_not(is_tail))
        def _full():
            _accumulate(x_ref[...], y_ref[...])

        @pl.when(is_tail)
        def _tail():
            xv = x_ref[...]
            yv = y_ref[...]
            lane = lax.broadcasted_iota(jnp.int32, xv.shape, 1)
            valid = (t * tile + lane) < s
            # Mask BEFORE any arithmetic so stale / duplicated lanes cannot leak.
            _accumulate(jnp.where(valid, xv, 0), jnp.where(valid, yv, 0))

    @pl.when(k == pl.num_programs(1) - 1)
    def _finalize():
        # Single cross-lane reduce + lane-aligned store; runs once per p block.
        tp_ref[...] = jnp.broadcast_to(
            jnp.sum(tp_acc[...], axis=-1, keepdims=True), tp_ref.shape)
        fpfn_ref[...] = jnp.broadcast_to(
            jnp.sum(fpfn_acc[...], axis=-1, keepdims=True), fpfn_ref.shape)


def reg_dice1(x, y, *, max_tile_lanes=None, force_n_par=None):
    """x, y: (b, c, *spatial) arrays of identical shape. Returns scalar f32 loss.

    max_tile_lanes / force_n_par: test hooks to force the tiled / multi-block
    paths on small inputs.
    """
    assert x.shape == y.shape
    b, c = x.shape[0], x.shape[1]
    bc = b * c
    s = math.prod(x.shape[2:]) if x.ndim > 2 else 1
    assert s < 2 ** 31  # int32 lane-index math inside the kernel

    # Reshape only; keep native dtype (no wrapper-side pad / cast pass).
    x2 = jnp.reshape(x, (bc, s))
    y2 = jnp.reshape(y, (bc, s))
    itemsize = jnp.dtype(x2.dtype).itemsize

    compute_dtype = (x2.dtype
                     if (x2.dtype == jnp.bfloat16 and _native_bf16_ok())
                     else jnp.float32)

    # Tile sizing: streaming reduction -> ~2 MiB blocks already hit the HBM
    # roofline; bigger only wastes VMEM and lengthens the exposed first DMA.
    lanes_cap = max(_LANE,
                    (_TARGET_BLOCK_BYTES // max(1, bc * itemsize)) // _LANE * _LANE)
    s_ceil = _cdiv(s, _LANE) * _LANE
    tile = min(s_ceil, lanes_cap)
    if max_tile_lanes is not None:
        tile = min(tile, max(_LANE, (max_tile_lanes // _LANE) * _LANE))
    if tile > s:
        tile = s  # single full-extent block; satisfies the "full dim" rule
    # TODO(synk): if bc were so large that even a 128-lane block blows the VMEM
    # budget, the bc axis would also need tiling; not needed for this loss.

    n_tiles = _cdiv(s, tile)
    n_par = force_n_par if force_n_par is not None else _num_tensorcores()
    n_par = max(1, min(n_par, n_tiles))
    spp = _cdiv(n_tiles, n_par)                 # reduction steps per parallel block
    need_mask = (n_par * spp * tile) != s       # any ragged or clamped tiles?

    def in_map(p, k):
        # Clamp so the DMA window is always in-bounds; the kernel zero-masks
        # any clamped duplicate tile.
        return (0, jnp.minimum(p * spp + k, n_tiles - 1))

    kernel = functools.partial(
        _regdice_kernel, s=s, tile=tile, spp=spp, need_mask=need_mask,
        compute_dtype=compute_dtype)

    # VMEM budget: 2 inputs x 2 pipeline buffers + 2 f32 accumulators + outputs.
    bc_pad = _cdiv(bc, _SUBLANE) * _SUBLANE
    tile_pad = _cdiv(tile, _LANE) * _LANE
    need_bytes = (2 * 2 * bc_pad * tile_pad * itemsize   # input double-buffers
                  + 2 * bc_pad * tile_pad * 4            # lane-wide accumulators
                  + 2 * 2 * bc_pad * _LANE * 4)          # output buffers
    try:
        phys_vmem = int(pltpu.get_tpu_info().vmem_capacity_bytes)
    except Exception:
        phys_vmem = 64 * 1024 * 1024   # conservative fallback: v7x per-core VMEM
    vmem_limit = min(max(need_bytes * 3 // 2 + (4 << 20), 16 << 20),
                     phys_vmem * 3 // 4)

    cost = pl.CostEstimate(
        flops=6 * bc * s,
        transcendentals=0,
        bytes_accessed=2 * bc * s * itemsize + 2 * bc * n_par * _LANE * 4)

    tp_p, fpfn_p = pl.pallas_call(
        kernel,
        out_shape=(
            jax.ShapeDtypeStruct((bc, n_par * _LANE), jnp.float32),
            jax.ShapeDtypeStruct((bc, n_par * _LANE), jnp.float32),
        ),
        grid_spec=pltpu.PrefetchScalarGridSpec(
            num_scalar_prefetch=0,
            grid=(n_par, spp),
            in_specs=[
                pl.BlockSpec((bc, tile), in_map),
                pl.BlockSpec((bc, tile), in_map),
            ],
            out_specs=[
                pl.BlockSpec((bc, _LANE), lambda p, k: (0, p)),
                pl.BlockSpec((bc, _LANE), lambda p, k: (0, p)),
            ],
            scratch_shapes=[
                pltpu.VMEM((bc, tile), jnp.float32),   # tp accumulator
                pltpu.VMEM((bc, tile), jnp.float32),   # fp+fn (= sum|x-y|) accumulator
            ],
        ),
        compiler_params=pltpu.CompilerParams(
            dimension_semantics=("parallel", "arbitrary"),
            vmem_limit_bytes=int(vmem_limit),
        ),
        cost_estimate=cost,
    )(x2, y2)

    # Tiny epilogue: combine per-core partials, form dice, mean.
    # TODO(synk): for n_par == 1 this could be folded into _finalize to save a
    # launch; kept in JAX so the 2-TensorCore (v7x) path shares the same code.
    tp = tp_p[:, ::_LANE].sum(axis=1)
    fpfn = fpfn_p[:, ::_LANE].sum(axis=1)
    dice = -(2.0 * tp + EPS) / (2.0 * tp + fpfn + EPS)
    return jnp.mean(dice)


def _reference(x, y):
    x = x.astype(jnp.float32)
    y = y.astype(jnp.float32)
    axes = tuple(range(2, x.ndim))
    tp = jnp.maximum(y - jnp.abs(x - y), 0.0).sum(axes)
    fp = jnp.maximum(x - y, 0.0).sum(axes)
    fn = jnp.maximum(y - x, 0.0).sum(axes)
    return jnp.mean(-(2.0 * tp + EPS) / (2.0 * tp + fp + fn + EPS))


if __name__ == "__main__":
    key = jax.random.PRNGKey(0)
    k1, k2, k3, k4 = jax.random.split(key, 4)

    # Case 1: documented 5-D (b, c, x, y, z) input; whole spatial extent fits
    # in one block -> single grid step, no masking.
    shape1 = (2, 4, 8, 8, 8)
    x1 = jax.random.uniform(k1, shape1, dtype=jnp.float32)
    y1 = jax.random.uniform(k2, shape1, dtype=jnp.float32)
    out1 = reg_dice1(x1, y1)
    jax.block_until_ready(out1)
    ref1 = _reference(x1, y1)
    assert jnp.allclose(out1, ref1, atol=1e-5, rtol=1e-5), (out1, ref1)

    # Case 2: force 128-lane tiles -> multi-step reduction with a ragged last
    # tile that takes the gated mask path (s = 576, bc = 6 sub-8 sublanes).
    shape2 = (2, 3, 8, 8, 9)
    x2 = jax.random.uniform(k3, shape2, dtype=jnp.float32)
    y2 = jax.random.uniform(k4, shape2, dtype=jnp.float32)
    out2 = reg_dice1(x2, y2, max_tile_lanes=128)
    jax.block_until_ready(out2)
    ref2 = _reference(x2, y2)
    assert jnp.allclose(out2, ref2, atol=1e-5, rtol=1e-5), (out2, ref2)

    # Case 3: force the 2-way parallel split (v7x path; runs serially on
    # single-core chips) -> exercises clamped duplicate tiles + partial combine.
    out3 = reg_dice1(x2, y2, max_tile_lanes=128, force_n_par=2)
    jax.block_until_ready(out3)
    assert jnp.allclose(out3, ref2, atol=1e-5, rtol=1e-5), (out3, ref2)

    # Case 4: bf16 inputs (native bf16 math on v6e/v7x, f32 upcast on v5e).
    x4 = x1.astype(jnp.bfloat16)
    y4 = y1.astype(jnp.bfloat16)
    out4 = reg_dice1(x4, y4)
    jax.block_until_ready(out4)
    ref4 = _reference(x4, y4)
    assert jnp.allclose(out4, ref4, atol=5e-2, rtol=5e-2), (out4, ref4)

    print("KERNEL_OK")
</pallas_src>

<mosaic_0001>
module attributes {stable_mosaic.version = 11 : i64} {
  func.func @_regdice_kernel(%arg0: i32, %arg1: i32, %arg2: memref<8x512xf32, #tpu.memory_space<vmem>>, %arg3: memref<8x512xf32, #tpu.memory_space<vmem>>, %arg4: memref<8x128xf32, #tpu.memory_space<vmem>>, %arg5: memref<8x128xf32, #tpu.memory_space<vmem>>, %arg6: memref<8x512xf32, #tpu.memory_space<vmem>>, %arg7: memref<8x512xf32, #tpu.memory_space<vmem>>) attributes {dimension_semantics = [#tpu.dimension_semantics<parallel>, #tpu.dimension_semantics<arbitrary>], iteration_bounds = array<i64: 1, 1>, scalar_prefetch = 0 : i64, scratch_operands = 2 : i64, tpu.core_type = #tpu.core_type<tc>, window_params = [{transform_indices = @transform_0, window_bounds = array<i64: 8, 512>}, {transform_indices = @transform_1, window_bounds = array<i64: 8, 512>}, {transform_indices = @transform_2, window_bounds = array<i64: 8, 128>}, {transform_indices = @transform_3, window_bounds = array<i64: 8, 128>}]} {
    %c0_i32 = arith.constant 0 : i32
    %0 = arith.cmpi eq, %arg1, %c0_i32 : i32
    %1 = arith.extui %0 : i1 to i32
    %c0_i32_0 = arith.constant 0 : i32
    %2 = arith.cmpi ne, %1, %c0_i32_0 : i32
    scf.if %2 {
      %cst_14 = arith.constant 0.000000e+00 : f32
      %19 = vector.broadcast %cst_14 : f32 to vector<8x512xf32>
      %c0_15 = arith.constant 0 : index
      %c0_16 = arith.constant 0 : index
      %20 = vector.load %arg6[%c0_15, %c0_16] : memref<8x512xf32, #tpu.memory_space<vmem>>, vector<8x512xf32>
      tpu.vector_store %arg6[%c0_15, %c0_16], %19 {strides = array<i32>} : memref<8x512xf32, #tpu.memory_space<vmem>>, vector<8x512xf32>,
      %cst_17 = arith.constant 0.000000e+00 : f32
      %21 = vector.broadcast %cst_17 : f32 to vector<8x512xf32>
      %c0_18 = arith.constant 0 : index
      %c0_19 = arith.constant 0 : index
      %22 = vector.load %arg7[%c0_18, %c0_19] : memref<8x512xf32, #tpu.memory_space<vmem>>, vector<8x512xf32>
      tpu.vector_store %arg7[%c0_18, %c0_19], %21 {strides = array<i32>} : memref<8x512xf32, #tpu.memory_space<vmem>>, vector<8x512xf32>,
    } else {
    }
    %c0 = arith.constant 0 : index
    %c0_1 = arith.constant 0 : index
    %3 = vector.load %arg2[%c0, %c0_1] : memref<8x512xf32, #tpu.memory_space<vmem>>, vector<8x512xf32>
    %c0_2 = arith.constant 0 : index
    %c0_3 = arith.constant 0 : index
    %4 = vector.load %arg3[%c0_2, %c0_3] : memref<8x512xf32, #tpu.memory_space<vmem>>, vector<8x512xf32>
    %5 = arith.subf %3, %4 : vector<8x512xf32>
    %6 = math.absf %5 : vector<8x512xf32>
    %7 = arith.subf %4, %6 : vector<8x512xf32>
    %cst = arith.constant 0.000000e+00 : f32
    %8 = vector.broadcast %cst : f32 to vector<8x512xf32>
    %9 = arith.maximumf %7, %8 : vector<8x512xf32>
    %c0_4 = arith.constant 0 : index
    %c0_5 = arith.constant 0 : index
    %10 = vector.load %arg6[%c0_4, %c0_5] : memref<8x512xf32, #tpu.memory_space<vmem>>, vector<8x512xf32>
    %11 = arith.addf %10, %9 : vector<8x512xf32>
    %c0_6 = arith.constant 0 : index
    %c0_7 = arith.constant 0 : index
    %12 = vector.load %arg6[%c0_6, %c0_7] : memref<8x512xf32, #tpu.memory_space<vmem>>, vector<8x512xf32>
    tpu.vector_store %arg6[%c0_6, %c0_7], %11 {strides = array<i32>} : memref<8x512xf32, #tpu.memory_space<vmem>>, vector<8x512xf32>,
    %c0_8 = arith.constant 0 : index
    %c0_9 = arith.constant 0 : index
    %13 = vector.load %arg7[%c0_8, %c0_9] : memref<8x512xf32, #tpu.memory_space<vmem>>, vector<8x512xf32>
    %14 = arith.addf %13, %6 : vector<8x512xf32>
    %c0_10 = arith.constant 0 : index
    %c0_11 = arith.constant 0 : index
    %15 = vector.load %arg7[%c0_10, %c0_11] : memref<8x512xf32, #tpu.memory_space<vmem>>, vector<8x512xf32>
    tpu.vector_store %arg7[%c0_10, %c0_11], %14 {strides = array<i32>} : memref<8x512xf32, #tpu.memory_space<vmem>>, vector<8x512xf32>,
    %c0_i32_12 = arith.constant 0 : i32
    %16 = arith.cmpi eq, %arg1, %c0_i32_12 : i32
    %17 = arith.extui %16 : i1 to i32
    %c0_i32_13 = arith.constant 0 : i32
    %18 = arith.cmpi ne, %17, %c0_i32_13 : i32
    scf.if %18 {
      %c0_14 = arith.constant 0 : index
      %c0_15 = arith.constant 0 : index
      %19 = vector.load %arg6[%c0_14, %c0_15] : memref<8x512xf32, #tpu.memory_space<vmem>>, vector<8x512xf32>
      %cst_16 = arith.constant dense<0.000000e+00> : vector<8xf32>
      %20 = vector.multi_reduction <add>, %19, %cst_16 [1] : vector<8x512xf32> to vector<8xf32>
      %21 = vector.shape_cast %20 : vector<8xf32> to vector<8x1xf32>
      %22 = vector.shape_cast %21 : vector<8x1xf32> to vector<8x1xf32>
      %23 = vector.broadcast %22 : vector<8x1xf32> to vector<8x128xf32>
      %c0_17 = arith.constant 0 : index
      %c0_18 = arith.constant 0 : index
      %24 = vector.load %arg4[%c0_17, %c0_18] : memref<8x128xf32, #tpu.memory_space<vmem>>, vector<8x128xf32>
      tpu.vector_store %arg4[%c0_17, %c0_18], %23 {strides = array<i32>} : memref<8x128xf32, #tpu.memory_space<vmem>>, vector<8x128xf32>,
      %c0_19 = arith.constant 0 : index
      %c0_20 = arith.constant 0 : index
      %25 = vector.load %arg7[%c0_19, %c0_20] : memref<8x512xf32, #tpu.memory_space<vmem>>, vector<8x512xf32>
      %cst_21 = arith.constant dense<0.000000e+00> : vector<8xf32>
      %26 = vector.multi_reduction <add>, %25, %cst_21 [1] : vector<8x512xf32> to vector<8xf32>
      %27 = vector.shape_cast %26 : vector<8xf32> to vector<8x1xf32>
      %28 = vector.shape_cast %27 : vector<8x1xf32> to vector<8x1xf32>
      %29 = vector.broadcast %28 : vector<8x1xf32> to vector<8x128xf32>
      %c0_22 = arith.constant 0 : index
      %c0_23 = arith.constant 0 : index
      %30 = vector.load %arg5[%c0_22, %c0_23] : memref<8x128xf32, #tpu.memory_space<vmem>>, vector<8x128xf32>
      tpu.vector_store %arg5[%c0_22, %c0_23], %29 {strides = array<i32>} : memref<8x128xf32, #tpu.memory_space<vmem>>, vector<8x128xf32>,
    } else {
    }
    return
  }
  func.func @transform_0(%arg0: i32, %arg1: i32) -> (i32, i32) {
    %c1_i32 = arith.constant 1 : i32
    %0 = arith.muli %arg0, %c1_i32 : i32
    %1 = arith.addi %0, %arg1 : i32
    %c0_i32 = arith.constant 0 : i32
    %2 = arith.minsi %1, %c0_i32 : i32
    %c0_i32_0 = arith.constant 0 : i32
    %c0_i32_1 = arith.constant 0 : i32
    return %c0_i32_0, %2 : i32, i32
  }
  func.func @transform_1(%arg0: i32, %arg1: i32) -> (i32, i32) {
    %c1_i32 = arith.constant 1 : i32
    %0 = arith.muli %arg0, %c1_i32 : i32
    %1 = arith.addi %0, %arg1 : i32
    %c0_i32 = arith.constant 0 : i32
    %2 = arith.minsi %1, %c0_i32 : i32
    %c0_i32_0 = arith.constant 0 : i32
    %c0_i32_1 = arith.constant 0 : i32
    return %c0_i32_0, %2 : i32, i32
  }
  func.func @transform_2(%arg0: i32, %arg1: i32) -> (i32, i32) {
    %c0_i32 = arith.constant 0 : i32
    %c0_i32_0 = arith.constant 0 : i32
    return %c0_i32, %arg0 : i32, i32
  }
  func.func @transform_3(%arg0: i32, %arg1: i32) -> (i32, i32) {
    %c0_i32 = arith.constant 0 : i32
    %c0_i32_0 = arith.constant 0 : i32
    return %c0_i32, %arg0 : i32, i32
  }
}

</mosaic_0001>

<bundles_post_ra>
// kernel: tpu_custom_call.1
= control target key start
LH: loop header
LB: loop body
LE: loop exit
PB: predicated region body
PF: predicated region fallthrough
CT: control target
= control target key end

     0   :  { %9 = vsyncpa [#allocation5], 0  ;;  %s348_s0 = inlined_call_operand.hbm [shape: f32[8,512], index: 0, kind: input, shape index: {}]   ;;  %s349_s1 = inlined_call_operand.hbm [shape: f32[8,512], index: 1, kind: input, shape index: {}]   ;;  %s350_s2 = inlined_call_operand.hbm [shape: f32[8,128], index: 2, kind: output, shape index: {0}]   ;;  %s351_s3 = inlined_call_operand.hbm [shape: f32[8,128], index: 3, kind: output, shape index: {1}]  }
   0x1   :  { %10 = vsyncpa [#allocation8], 0 }
   0x2   :  { %11 = vsyncpa [#allocation6], 0 }
   0x3   :  { %12 = vsyncpa [#allocation11], 0  ;;  %s276_s12 = smov [#allocation4]   ;;  %s277_s14 = smov [#allocation7]  }
   0x4   :  { %s25_s13 = sshll.u32 %s276_s12, 4  ;;  %s41_s15 = sshll.u32 %s277_s14, 4  ;;  %s26_s13 = int_to_ptr.vmem [resolvable:$true] %s25_s13  ;;  %s42_s15 = int_to_ptr.vmem [resolvable:$true] %s41_s15 }
   0x5   :  { %s180_s18 = scalar_lea.hbm %s348_s0, 512 }
   0x6   :  { %p181_p0 = scmp.ne.s32.totalorder %s348_s0, %s180_s18  ;;  %p184_p1 = scmp.lt.u32.totalorder %s180_s18, %s348_s0 }
   0x8   :  { %p186_p2 = pnand %p184_p1, %p181_p0 }
   0xa   :  { %189 = shalt.err (!%p186_p2)
}
   0xb   :  { %s190_s23 = scalar_lea.vmem %s26_s13, 512  ;;  %p195_p4 = scmp.lt.s32.totalorder %s26_s13, %s26_s13 }
   0xc   :  { %p191_p3 = scmp.ne.s32.totalorder %s26_s13, %s190_s23  ;;  %p196_p5 = scmp.lt.s32.totalorder %s190_s23, %s190_s23 }
   0xe   :  { %p197_p6 = por %p196_p5, %p195_p4 }
  0x10   :  { %p198_p7 = pnand %p197_p6, %p191_p3 }
  0x12   :  { %201 = shalt.err (!%p198_p7)
}
  0x13   :  { %28 = dma.hbm_to_vmem [thread:$0]  %s348_s0, 512, %s26_s13, [#allocation5]  }
  0x14   :  { %s202_s28 = scalar_lea.hbm %s349_s1, 512 }
  0x15   :  { %p203_p8 = scmp.ne.s32.totalorder %s349_s1, %s202_s28  ;;  %p206_p9 = scmp.lt.u32.totalorder %s202_s28, %s349_s1 }
  0x17   :  { %p208_p10 = pnand %p206_p9, %p203_p8 }
  0x19   :  { %211 = shalt.err (!%p208_p10)
}
  0x1a   :  { %s212_s6 = scalar_lea.vmem %s42_s15, 512  ;;  %p217_p12 = scmp.lt.s32.totalorder %s42_s15, %s42_s15 }
  0x1b   :  { %p213_p11 = scmp.ne.s32.totalorder %s42_s15, %s212_s6  ;;  %p218_p13 = scmp.lt.s32.totalorder %s212_s6, %s212_s6 }
  0x1d   :  { %p219_p0 = por %p218_p13, %p217_p12 }
  0x1f   :  { %p220_p1 = pnand %p219_p0, %p213_p11 }
  0x21   :  { %223 = shalt.err (!%p220_p1)
}
  0x22   :  { %44 = dma.hbm_to_vmem [thread:$0]  %s349_s1, 512, %s42_s15, [#allocation8]  }
  0x23   :  { %268 = dma.done.wait [#allocation5], 512  }
  0x24   :  { %269 = vsyncadd [#allocation5], 4294966784 }
  0x25   :  { %270 = dma.done.wait [#allocation8], 512  }
  0x26   :  { %271 = vsyncadd [#allocation8], 4294966784  ;;  %v71_v0 = vld [vmem:[#allocation4] sm:$0xff]  ;;  %v72_v1 = vld [vmem:[#allocation4 + $0x8] sm:$0xff]  ;;  %s278_s1 = smov [#allocation9]   ;;  %s279_s9 = smov [#allocation10]  }
  0x27   :  { %v73_v2 = vld [vmem:[#allocation4 + $0x10] sm:$0xff]  ;;  %v74_v3 = vld [vmem:[#allocation4 + $0x18] sm:$0xff]  ;;  %v75_v4 = vld [vmem:[#allocation7] sm:$0xff]  ;;  %s148_s8 = sshll.u32 %s278_s1, 4  ;;  %s158_s10 = sshll.u32 %s279_s9, 4  ;;  %s149_s8 = int_to_ptr.vmem [resolvable:$true] %s148_s8  ;;  %s159_s10 = int_to_ptr.vmem [resolvable:$true] %s158_s10 }
  0x28   :  { %v76_v5 = vld [vmem:[#allocation7 + $0x8] sm:$0xff]  ;;  %v77_v6 = vld [vmem:[#allocation7 + $0x10] sm:$0xff]  ;;  %v78_v7 = vld [vmem:[#allocation7 + $0x18] sm:$0xff]  ;;  %v79_v8 = vsub.f32 %v71_v0, %v75_v4  ;;  %s224_s11 = scalar_lea.vmem %s149_s8, 128  ;;  %p229_p3 = scmp.lt.s32.totalorder %s149_s8, %s149_s8 }
  0x29   :  { %v80_v9 = vsub.f32 %v72_v1, %v76_v5  ;;  %v81_v10 = vsub.f32 %v73_v2, %v77_v6  ;;  %v82_v11 = vsub.f32 %v74_v3, %v78_v7  ;;  %p225_p2 = scmp.ne.s32.totalorder %s149_s8, %s224_s11  ;;  %p230_p4 = scmp.lt.s32.totalorder %s224_s11, %s224_s11 }
  0x2a   :  { %v83_v12 = vand.u32 2147483647, %v79_v8 }
  0x2b   :  { %v84_v13 = vand.u32 2147483647, %v80_v9  ;;  %v85_v14 = vand.u32 2147483647, %v81_v10  ;;  %v86_v15 = vand.u32 2147483647, %v82_v11  ;;  %p231_p5 = por %p230_p4, %p229_p3 }
  0x2c   :  { %v87_v16 = vsub.f32 %v75_v4, %v83_v12 }
  0x2d   :  { %v88_v17 = vsub.f32 %v76_v5, %v84_v13  ;;  %v89_v18 = vsub.f32 %v77_v6, %v85_v14  ;;  %v90_v19 = vsub.f32 %v78_v7, %v86_v15  ;;  %v136_v22 = vadd.f32 %v84_v13, %v83_v12  ;;  %p232_p6 = pnand %p231_p5, %p225_p2 }
  0x2e   :  { %v91_v20 = vmax.f32 %v87_v16, 0.0 }
  0x2f   :  { %v92_v21 = vmax.f32 %v88_v17, 0.0  ;;  %v93_v23 = vmax.f32 %v89_v18, 0.0  ;;  %v94_v24 = vmax.f32 %v90_v19, 0.0  ;;  %v137_v27 = vadd.f32 %v136_v22, %v85_v14 }
  0x31   :  { %v126_v25 = vadd.f32 %v92_v21, %v91_v20  ;;  %v138_v29 = vadd.f32 %v137_v27, %v86_v15 }
  0x33   :  { %v127_v26 = vadd.f32 %v126_v25, %v93_v23 }
  0x35   :  { %v128_v28 = vadd.f32 %v127_v26, %v94_v24 }
  0x37   :  { %129 = vadd.xlane.f32.xlu0 %v128_v28 }
  0x3b   :  { %139 = vadd.xlane.f32.xlu0 %v138_v29 }
  0xc4   :  { %v130_v30 = vpop.xlane.xlu0 %129 }
  0xc5   :  { %131 = vst [vmem:[#allocation9] sm:$0xff] %v130_v30 }
  0xc6   :  { %235 = shalt.err (!%p232_p6)
}
  0xc7   :  { %s236_s14 = scalar_lea.hbm %s350_s2, 128 }
  0xc8   :  { %p237_p7 = scmp.ne.s32.totalorder %s350_s2, %s236_s14  ;;  %p240_p8 = scmp.lt.u32.totalorder %s236_s14, %s350_s2 }
  0xca   :  { %p242_p9 = pnand %p240_p8, %p237_p7 }
  0xcc   :  { %245 = shalt.err (!%p242_p9)
}
  0xcd   :  { %151 = dma.vmem_to_hbm [thread:$0]  %s149_s8, 128, %s350_s2, [#allocation6]   ;;  %v140_v31 = vpop.xlane.xlu0 %139 }
  0xce   :  { %141 = vst [vmem:[#allocation10] sm:$0xff] %v140_v31  ;;  %s246_s21 = scalar_lea.vmem %s159_s10, 128  ;;  %p251_p11 = scmp.lt.s32.totalorder %s159_s10, %s159_s10 }
  0xcf   :  { %p247_p10 = scmp.ne.s32.totalorder %s159_s10, %s246_s21  ;;  %p252_p12 = scmp.lt.s32.totalorder %s246_s21, %s246_s21 }
  0xd1   :  { %p253_p13 = por %p252_p12, %p251_p11 }
  0xd3   :  { %p254_p0 = pnand %p253_p13, %p247_p10 }
  0xd5   :  { %257 = shalt.err (!%p254_p0)
}
  0xd6   :  { %s258_s24 = scalar_lea.hbm %s351_s3, 128 }
  0xd7   :  { %p259_p1 = scmp.ne.s32.totalorder %s351_s3, %s258_s24  ;;  %p262_p2 = scmp.lt.u32.totalorder %s258_s24, %s351_s3 }
  0xd9   :  { %p264_p3 = pnand %p262_p2, %p259_p1 }
  0xdb   :  { %267 = shalt.err (!%p264_p3)
}
  0xdc   :  { %161 = dma.vmem_to_hbm [thread:$0]  %s159_s10, 128, %s351_s3, [#allocation11]  }
  0xdd   :  { %272 = dma.done.wait [#allocation6], 128  }
  0xde   :  { %273 = vsyncadd [#allocation6], 4294967168 }
  0xdf   :  { %274 = dma.done.wait [#allocation11], 128  }
  0xe0   :  { %275 = vsyncadd [#allocation11], 4294967168 }
  0xe1   :  { %168 = vsyncpa [#allocation5], 1 }
  0xe2   :  { %169 = vsyncpa [#allocation8], 1 }
  0xe3   :  { %170 = vsyncpa [#allocation6], 1 }
  0xe4   :  { %171 = vsyncpa [#allocation11], 1 }

</bundles_post_ra>
